<compile_context>
chip_gen: v7x
topology: tpu7x:2x2x1
jax: 0.10.0
libtpu: 0.0.40
codegen_flags: <defaults>
</compile_context>

<pallas_src>
import jax
import jax.numpy as jnp
from jax.experimental import pallas as pl
from jax.experimental.pallas import tpu as pltpu

_LANE = 128  # vreg lane width


def _round_up(x, m):
    return (x + m - 1) // m * m


def _cdiv(a, b):
    return (a + b - 1) // b


def _sublane_multiple(dtype):
    # Sub-32-bit dtypes pack along sublanes: f32 -> 8, bf16 -> 16, int8 -> 32.
    return max(8, 32 // jnp.dtype(dtype).itemsize)


def _vmem_capacity_bytes():
    try:
        cap = getattr(pltpu.get_tpu_info(), "vmem_capacity_bytes", None)
        if cap:
            return int(cap)
    except Exception:
        pass
    return 64 * 1024 * 1024  # conservative fallback (v7x per-core VMEM)


# ---------------------------------------------------------------------------
# Kernels
# ---------------------------------------------------------------------------
def _mlp_fused_kernel(x_ref, wh_ref, bh_ref, wo_ref, bo_ref, o_ref):
    """grid = (batch_tiles,). Whole weight stack resident in VMEM.

    x_ref : [TB, S_pad]
    wh_ref: [n_hidden, S_pad, S_pad]
    bh_ref: [n_hidden, 1, S_pad]
    wo_ref: [S_pad, A_pad]
    bo_ref: [1, A_pad]
    o_ref : [TB, A_pad]
    """
    n_hidden = wh_ref.shape[0]
    h = x_ref[...].astype(jnp.float32)
    # n_hidden is a trace-time constant, so this Python loop is fully unrolled:
    # every per-layer weight slice is a static view and the scheduler can
    # overlap consecutive layers.  (No per-layer grid-step overhead.)
    for l in range(n_hidden):
        w = wh_ref[l]                                   # [S_pad, S_pad]
        y = jnp.dot(h.astype(w.dtype), w, preferred_element_type=jnp.float32)
        h = jnp.maximum(y + bh_ref[l].astype(jnp.float32), 0.0)   # ReLU
    wo = wo_ref[...]                                    # [S_pad, A_pad]
    out = jnp.dot(h.astype(wo.dtype), wo, preferred_element_type=jnp.float32)
    out = out + bo_ref[...].astype(jnp.float32)
    o_ref[...] = out.astype(o_ref.dtype)                # lane-dense store


def _mlp_streamed_kernel(x_ref, wh_ref, bh_ref, wo_ref, bo_ref, o_ref, h_ref):
    """grid = (batch_tiles, n_hidden). One hidden layer streamed per step.

    h_ref : [TB, S_pad] f32 VMEM scratch holding the running activation.
    """
    layer = pl.program_id(1)
    n_hidden = pl.num_programs(1)

    @pl.when(layer == 0)
    def _():
        h_ref[...] = x_ref[...].astype(jnp.float32)

    w = wh_ref[0]                                       # [S_pad, S_pad]
    y = jnp.dot(h_ref[...].astype(w.dtype), w, preferred_element_type=jnp.float32)
    h = jnp.maximum(y + bh_ref[0].astype(jnp.float32), 0.0)
    h_ref[...] = h

    @pl.when(layer == n_hidden - 1)
    def _():
        # Reuse `h` (already in vregs) — no re-read of the VMEM scratch.
        wo = wo_ref[...]
        out = jnp.dot(h.astype(wo.dtype), wo, preferred_element_type=jnp.float32)
        out = out + bo_ref[...].astype(jnp.float32)
        o_ref[...] = out.astype(o_ref.dtype)


# ---------------------------------------------------------------------------
# Wrapper
# ---------------------------------------------------------------------------
def nn_agent_forward(x, w_hidden, b_hidden, w_out, b_out, *,
                     batch_tile=None, compute_dtype=None, fuse_layers=None):
    """Fused MLP forward: x[B,S] -> [B,A].  Weights are [in, out] (= W_pt.T)."""
    n_hidden, S, _ = w_hidden.shape
    B = x.shape[0]
    A = w_out.shape[1]
    b_hidden = b_hidden.reshape(n_hidden, 1, S)
    b_out = b_out.reshape(1, A)

    if compute_dtype is not None:
        # e.g. bf16 on v6e/v7x: halves weight DMA bytes, hits the bf16 MXU.
        w_hidden = w_hidden.astype(compute_dtype)
        b_hidden = b_hidden.astype(compute_dtype)
        w_out = w_out.astype(compute_dtype)
        b_out = b_out.astype(compute_dtype)

    act_bytes = jnp.dtype(x.dtype).itemsize
    w_bytes = jnp.dtype(w_hidden.dtype).itemsize

    S_pad = _round_up(S, _LANE)
    A_pad = _round_up(A, _LANE)
    sub = _sublane_multiple(x.dtype)

    # Generation-aware VMEM budget (~56 MiB on v7x, ~100 MiB on v5e/v6e).
    vmem_budget = min(int(_vmem_capacity_bytes() * 0.85), 100 * 2**20)

    # ---- batch tile ---------------------------------------------------------
    if batch_tile is None:
        batch_tile = 512 if vmem_budget >= 80 * 2**20 else 256
    TB = _round_up(min(batch_tile, _round_up(B, sub)), sub)
    # Prefer >= 2 batch tiles so the "parallel" axis has work for both
    # TensorCores on v7x (and deeper pipelining elsewhere).
    if _round_up(B, sub) // TB < 2 and _round_up(B, sub) >= 2 * sub:
        TB = _round_up(_cdiv(_round_up(B, sub), 2), sub)

    # ---- path selection -----------------------------------------------------
    weight_stack_bytes = 2 * (n_hidden * (S_pad * S_pad + S_pad)
                              + S_pad * A_pad + A_pad) * w_bytes
    if fuse_layers is None:
        fuse_layers = weight_stack_bytes <= vmem_budget // 2

    def vmem_needed(tb):
        if fuse_layers:
            return (2 * tb * S_pad * act_bytes        # x tile (double-buffered)
                    + weight_stack_bytes              # resident weight stack
                    + 2 * tb * A_pad * act_bytes      # out tile
                    + 2 * tb * S_pad * 4)             # live f32 activation
        return (2 * tb * S_pad * act_bytes
                + 2 * (S_pad * S_pad + S_pad) * w_bytes   # one streamed layer
                + 2 * (S_pad * A_pad + A_pad) * w_bytes   # output projection
                + 2 * tb * A_pad * act_bytes
                + 3 * tb * S_pad * 4)                     # scratch + temporaries

    while vmem_needed(TB) > vmem_budget and TB > sub:
        TB = max(sub, _round_up(TB // 2, sub))
    # TODO(synk): for S_pad so large that even one double-buffered [S_pad,S_pad]
    # weight block exceeds the budget, add a column-blocked 3rd grid axis.

    B_pad = _round_up(B, TB)
    grid0 = B_pad // TB
    needed = vmem_needed(TB)
    vmem_limit = int(min(vmem_budget, max(2 * needed, 32 * 2**20)))

    # ---- zero-pad to lane-dense shapes --------------------------------------
    xp = jnp.zeros((B_pad, S_pad), x.dtype).at[:B, :S].set(x)
    whp = jnp.zeros((n_hidden, S_pad, S_pad), w_hidden.dtype).at[:, :S, :S].set(w_hidden)
    bhp = jnp.zeros((n_hidden, 1, S_pad), b_hidden.dtype).at[:, :, :S].set(b_hidden)
    wop = jnp.zeros((S_pad, A_pad), w_out.dtype).at[:S, :A].set(w_out)
    bop = jnp.zeros((1, A_pad), b_out.dtype).at[:, :A].set(b_out)

    # ---- scheduler hint ------------------------------------------------------
    flops = 2 * B_pad * S_pad * S_pad * n_hidden + 2 * B_pad * S_pad * A_pad
    if fuse_layers:
        weight_traffic = (whp.size + bhp.size + wop.size + bop.size) * w_bytes
    else:
        # Hidden-layer weights are re-streamed once per batch tile.
        weight_traffic = (grid0 * (whp.size + bhp.size) + wop.size + bop.size) * w_bytes
    bytes_accessed = int(xp.size * act_bytes + weight_traffic + B_pad * A_pad * act_bytes)
    cost = pl.CostEstimate(flops=int(flops), transcendentals=0,
                           bytes_accessed=bytes_accessed)

    if fuse_layers:
        out_padded = pl.pallas_call(
            _mlp_fused_kernel,
            out_shape=jax.ShapeDtypeStruct((B_pad, A_pad), x.dtype),
            grid_spec=pltpu.PrefetchScalarGridSpec(
                num_scalar_prefetch=0,
                grid=(grid0,),
                in_specs=[
                    pl.BlockSpec((TB, S_pad), lambda b: (b, 0)),                  # x
                    pl.BlockSpec((n_hidden, S_pad, S_pad), lambda b: (0, 0, 0)),  # W stack
                    pl.BlockSpec((n_hidden, 1, S_pad), lambda b: (0, 0, 0)),      # b stack
                    pl.BlockSpec((S_pad, A_pad), lambda b: (0, 0)),               # W_out
                    pl.BlockSpec((1, A_pad), lambda b: (0, 0)),                   # b_out
                ],
                out_specs=pl.BlockSpec((TB, A_pad), lambda b: (b, 0)),
            ),
            compiler_params=pltpu.CompilerParams(
                dimension_semantics=("parallel",),
                vmem_limit_bytes=vmem_limit,
            ),
            cost_estimate=cost,
        )(xp, whp, bhp, wop, bop)
    else:
        out_padded = pl.pallas_call(
            _mlp_streamed_kernel,
            out_shape=jax.ShapeDtypeStruct((B_pad, A_pad), x.dtype),
            grid_spec=pltpu.PrefetchScalarGridSpec(
                num_scalar_prefetch=0,
                grid=(grid0, n_hidden),
                in_specs=[
                    pl.BlockSpec((TB, S_pad), lambda b, l: (b, 0)),               # x
                    pl.BlockSpec((1, S_pad, S_pad), lambda b, l: (l, 0, 0)),      # W[l]
                    pl.BlockSpec((1, 1, S_pad), lambda b, l: (l, 0, 0)),          # b[l]
                    pl.BlockSpec((S_pad, A_pad), lambda b, l: (0, 0)),            # W_out
                    pl.BlockSpec((1, A_pad), lambda b, l: (0, 0)),                # b_out
                ],
                out_specs=pl.BlockSpec((TB, A_pad), lambda b, l: (b, 0)),
                scratch_shapes=[pltpu.VMEM((TB, S_pad), jnp.float32)],
            ),
            compiler_params=pltpu.CompilerParams(
                dimension_semantics=("parallel", "arbitrary"),
                vmem_limit_bytes=vmem_limit,
            ),
            cost_estimate=cost,
        )(xp, whp, bhp, wop, bop)

    return out_padded[:B, :A]


# ---------------------------------------------------------------------------
# Params / reference
# ---------------------------------------------------------------------------
def init_params(key, n_layer, state_size, action_size, dtype=jnp.float32):
    """Deterministic init mimicking PyTorch nn.Linear default (U[-1/sqrt(fan_in), ...])."""
    n_hidden = n_layer + 1  # first Linear(S,S) plus n_layer additional ones
    keys = jax.random.split(key, 4)
    bound_s = 1.0 / jnp.sqrt(state_size)

    w_hidden = jax.random.uniform(
        keys[0], (n_hidden, state_size, state_size), dtype, -bound_s, bound_s)
    b_hidden = jax.random.uniform(
        keys[1], (n_hidden, 1, state_size), dtype, -bound_s, bound_s)
    w_out = jax.random.uniform(
        keys[2], (state_size, action_size), dtype, -bound_s, bound_s)
    b_out = jax.random.uniform(
        keys[3], (1, action_size), dtype, -bound_s, bound_s)
    return w_hidden, b_hidden, w_out, b_out


def reference_forward(x, w_hidden, b_hidden, w_out, b_out):
    h = x
    for i in range(w_hidden.shape[0]):
        h = jnp.maximum(h @ w_hidden[i] + b_hidden[i], 0.0)
    return h @ w_out + b_out


if __name__ == "__main__":
    n_layer = 2
    state_size = 32
    action_size = 8
    batch = 8

    key = jax.random.PRNGKey(0)
    k_x, k_p = jax.random.split(key)

    x = jax.random.normal(k_x, (batch, state_size), dtype=jnp.float32)
    w_hidden, b_hidden, w_out, b_out = init_params(
        k_p, n_layer, state_size, action_size)
    ref = reference_forward(x, w_hidden, b_hidden, w_out, b_out)

    # 1) Default config -> fused layer-loop path.
    out = jax.block_until_ready(
        nn_agent_forward(x, w_hidden, b_hidden, w_out, b_out))
    assert out.shape == (batch, action_size)
    assert jnp.allclose(out, ref, atol=1e-5, rtol=1e-5), "fused path mismatch"

    # 2) Forced streamed-layer path (fallback used for large S).
    out_s = jax.block_until_ready(
        nn_agent_forward(x, w_hidden, b_hidden, w_out, b_out, fuse_layers=False))
    assert jnp.allclose(out_s, ref, atol=1e-5, rtol=1e-5), "streamed path mismatch"

    # 3) bf16 weights (v6e/v7x MXU fast path), loose tolerance.
    out_bf = jax.block_until_ready(
        nn_agent_forward(x, w_hidden, b_hidden, w_out, b_out,
                         compute_dtype=jnp.bfloat16))
    assert jnp.allclose(out_bf, ref, atol=7e-2, rtol=7e-2), "bf16 path mismatch"

    print("KERNEL_OK")
</pallas_src>

<mosaic_0001>
module attributes {stable_mosaic.version = 11 : i64} {
  func.func @_mlp_fused_kernel(%arg0: i32, %arg1: memref<8x128xf32, #tpu.memory_space<vmem>>, %arg2: memref<3x128x128xf32, #tpu.memory_space<vmem>>, %arg3: memref<3x1x128xf32, #tpu.memory_space<vmem>>, %arg4: memref<128x128xf32, #tpu.memory_space<vmem>>, %arg5: memref<1x128xf32, #tpu.memory_space<vmem>>, %arg6: memref<8x128xf32, #tpu.memory_space<vmem>>) attributes {dimension_semantics = [#tpu.dimension_semantics<parallel>], iteration_bounds = array<i64: 1>, scalar_prefetch = 0 : i64, scratch_operands = 0 : i64, tpu.core_type = #tpu.core_type<tc>, window_params = [{transform_indices = @transform_0, window_bounds = array<i64: 8, 128>}, {pipeline_mode = #tpu.pipeline_mode<synchronous>, transform_indices = @transform_1, window_bounds = array<i64: 3, 128, 128>}, {pipeline_mode = #tpu.pipeline_mode<synchronous>, transform_indices = @transform_2, window_bounds = array<i64: 3, 1, 128>}, {pipeline_mode = #tpu.pipeline_mode<synchronous>, transform_indices = @transform_3, window_bounds = array<i64: 128, 128>}, {pipeline_mode = #tpu.pipeline_mode<synchronous>, transform_indices = @transform_4, window_bounds = array<i64: 1, 128>}, {transform_indices = @transform_5, window_bounds = array<i64: 8, 128>}]} {
    %c0 = arith.constant 0 : index
    %c0_0 = arith.constant 0 : index
    %0 = vector.load %arg1[%c0, %c0_0] : memref<8x128xf32, #tpu.memory_space<vmem>>, vector<8x128xf32>
    %c0_1 = arith.constant 0 : index
    %c0_2 = arith.constant 0 : index
    %c0_3 = arith.constant 0 : index
    %1 = vector.load %arg2[%c0_1, %c0_2, %c0_3] : memref<3x128x128xf32, #tpu.memory_space<vmem>>, vector<1x128x128xf32>
    %2 = vector.shape_cast %1 : vector<1x128x128xf32> to vector<128x128xf32>
    %cst = arith.constant dense<0.000000e+00> : vector<8x128xf32>
    %3 = tpu.matmul %0, %2, %cst {dimension_numbers = #tpu.dot_dimension_numbers<[1], [0], [0], [1], [0, 0, 1, 1], [], []>} : vector<8x128xf32>, vector<128x128xf32>, vector<8x128xf32> -> vector<8x128xf32>
    %c0_4 = arith.constant 0 : index
    %c0_5 = arith.constant 0 : index
    %c0_6 = arith.constant 0 : index
    %4 = vector.load %arg3[%c0_4, %c0_5, %c0_6] : memref<3x1x128xf32, #tpu.memory_space<vmem>>, vector<1x1x128xf32>
    %5 = vector.shape_cast %4 : vector<1x1x128xf32> to vector<1x128xf32>
    %6 = vector.broadcast %5 : vector<1x128xf32> to vector<8x128xf32>
    %7 = arith.addf %3, %6 : vector<8x128xf32>
    %cst_7 = arith.constant 0.000000e+00 : f32
    %8 = vector.broadcast %cst_7 : f32 to vector<8x128xf32>
    %9 = arith.maximumf %7, %8 : vector<8x128xf32>
    %c1 = arith.constant 1 : index
    %c0_8 = arith.constant 0 : index
    %c0_9 = arith.constant 0 : index
    %10 = vector.load %arg2[%c1, %c0_8, %c0_9] : memref<3x128x128xf32, #tpu.memory_space<vmem>>, vector<1x128x128xf32>
    %11 = vector.shape_cast %10 : vector<1x128x128xf32> to vector<128x128xf32>
    %cst_10 = arith.constant dense<0.000000e+00> : vector<8x128xf32>
    %12 = tpu.matmul %9, %11, %cst_10 {dimension_numbers = #tpu.dot_dimension_numbers<[1], [0], [0], [1], [0, 0, 1, 1], [], []>} : vector<8x128xf32>, vector<128x128xf32>, vector<8x128xf32> -> vector<8x128xf32>
    %c1_11 = arith.constant 1 : index
    %c0_12 = arith.constant 0 : index
    %c0_13 = arith.constant 0 : index
    %13 = vector.load %arg3[%c1_11, %c0_12, %c0_13] : memref<3x1x128xf32, #tpu.memory_space<vmem>>, vector<1x1x128xf32>
    %14 = vector.shape_cast %13 : vector<1x1x128xf32> to vector<1x128xf32>
    %15 = vector.broadcast %14 : vector<1x128xf32> to vector<8x128xf32>
    %16 = arith.addf %12, %15 : vector<8x128xf32>
    %cst_14 = arith.constant 0.000000e+00 : f32
    %17 = vector.broadcast %cst_14 : f32 to vector<8x128xf32>
    %18 = arith.maximumf %16, %17 : vector<8x128xf32>
    %c2 = arith.constant 2 : index
    %c0_15 = arith.constant 0 : index
    %c0_16 = arith.constant 0 : index
    %19 = vector.load %arg2[%c2, %c0_15, %c0_16] : memref<3x128x128xf32, #tpu.memory_space<vmem>>, vector<1x128x128xf32>
    %20 = vector.shape_cast %19 : vector<1x128x128xf32> to vector<128x128xf32>
    %cst_17 = arith.constant dense<0.000000e+00> : vector<8x128xf32>
    %21 = tpu.matmul %18, %20, %cst_17 {dimension_numbers = #tpu.dot_dimension_numbers<[1], [0], [0], [1], [0, 0, 1, 1], [], []>} : vector<8x128xf32>, vector<128x128xf32>, vector<8x128xf32> -> vector<8x128xf32>
    %c2_18 = arith.constant 2 : index
    %c0_19 = arith.constant 0 : index
    %c0_20 = arith.constant 0 : index
    %22 = vector.load %arg3[%c2_18, %c0_19, %c0_20] : memref<3x1x128xf32, #tpu.memory_space<vmem>>, vector<1x1x128xf32>
    %23 = vector.shape_cast %22 : vector<1x1x128xf32> to vector<1x128xf32>
    %24 = vector.broadcast %23 : vector<1x128xf32> to vector<8x128xf32>
    %25 = arith.addf %21, %24 : vector<8x128xf32>
    %cst_21 = arith.constant 0.000000e+00 : f32
    %26 = vector.broadcast %cst_21 : f32 to vector<8x128xf32>
    %27 = arith.maximumf %25, %26 : vector<8x128xf32>
    %c0_22 = arith.constant 0 : index
    %c0_23 = arith.constant 0 : index
    %28 = vector.load %arg4[%c0_22, %c0_23] : memref<128x128xf32, #tpu.memory_space<vmem>>, vector<128x128xf32>
    %cst_24 = arith.constant dense<0.000000e+00> : vector<8x128xf32>
    %29 = tpu.matmul %27, %28, %cst_24 {dimension_numbers = #tpu.dot_dimension_numbers<[1], [0], [0], [1], [0, 0, 1, 1], [], []>} : vector<8x128xf32>, vector<128x128xf32>, vector<8x128xf32> -> vector<8x128xf32>
    %c0_25 = arith.constant 0 : index
    %c0_26 = arith.constant 0 : index
    %30 = vector.load %arg5[%c0_25, %c0_26] : memref<1x128xf32, #tpu.memory_space<vmem>>, vector<1x128xf32>
    %31 = vector.broadcast %30 : vector<1x128xf32> to vector<8x128xf32>
    %32 = arith.addf %29, %31 : vector<8x128xf32>
    %c0_27 = arith.constant 0 : index
    %c0_28 = arith.constant 0 : index
    %33 = vector.load %arg6[%c0_27, %c0_28] : memref<8x128xf32, #tpu.memory_space<vmem>>, vector<8x128xf32>
    tpu.vector_store %arg6[%c0_27, %c0_28], %32 {strides = array<i32>} : memref<8x128xf32, #tpu.memory_space<vmem>>, vector<8x128xf32>,
    return
  }
  func.func @transform_0(%arg0: i32) -> (i32, i32) {
    %c0_i32 = arith.constant 0 : i32
    %c0_i32_0 = arith.constant 0 : i32
    return %arg0, %c0_i32 : i32, i32
  }
  func.func @transform_1(%arg0: i32) -> (i32, i32, i32) {
    %c0_i32 = arith.constant 0 : i32
    %c0_i32_0 = arith.constant 0 : i32
    %c0_i32_1 = arith.constant 0 : i32
    %c0_i32_2 = arith.constant 0 : i32
    return %c0_i32, %c0_i32_0, %c0_i32_1 : i32, i32, i32
  }
  func.func @transform_2(%arg0: i32) -> (i32, i32, i32) {
    %c0_i32 = arith.constant 0 : i32
    %c0_i32_0 = arith.constant 0 : i32
    %c0_i32_1 = arith.constant 0 : i32
    %c0_i32_2 = arith.constant 0 : i32
    return %c0_i32, %c0_i32_0, %c0_i32_1 : i32, i32, i32
  }
  func.func @transform_3(%arg0: i32) -> (i32, i32) {
    %c0_i32 = arith.constant 0 : i32
    %c0_i32_0 = arith.constant 0 : i32
    %c0_i32_1 = arith.constant 0 : i32
    return %c0_i32, %c0_i32_0 : i32, i32
  }
  func.func @transform_4(%arg0: i32) -> (i32, i32) {
    %c0_i32 = arith.constant 0 : i32
    %c0_i32_0 = arith.constant 0 : i32
    %c0_i32_1 = arith.constant 0 : i32
    return %c0_i32, %c0_i32_0 : i32, i32
  }
  func.func @transform_5(%arg0: i32) -> (i32, i32) {
    %c0_i32 = arith.constant 0 : i32
    %c0_i32_0 = arith.constant 0 : i32
    return %arg0, %c0_i32 : i32, i32
  }
}

</mosaic_0001>

<bundles_post_ra>
// kernel: tpu_custom_call.1
= control target key start
LH: loop header
LB: loop body
LE: loop exit
PB: predicated region body
PF: predicated region fallthrough
CT: control target
= control target key end

     0   :  { %10 = vsyncpa [#allocation3], 0  ;;  %s1015_s0 = inlined_call_operand.hbm [shape: f32[8,128], index: 0, kind: input, shape index: {}]   ;;  %s1016_s1 = inlined_call_operand.hbm [shape: f32[3,128,128], index: 1, kind: input, shape index: {}]   ;;  %s1017_s2 = inlined_call_operand.vmem [shape: f32[3,1,128], index: 2, kind: input, shape index: {}]   ;;  %s1018_s3 = inlined_call_operand.hbm [shape: f32[128,128], index: 3, kind: input, shape index: {}]   ;;  %s1019_s4 = inlined_call_operand.vmem [shape: f32[1,128], index: 4, kind: input, shape index: {}]   ;;  %s1020_s5 = inlined_call_operand.hbm [shape: f32[8,128], index: 5, kind: output, shape index: {}]  }
   0x1   :  { %11 = vsyncpa [#allocation6], 0 }
   0x2   :  { %12 = vsyncpa [#allocation4], 0  ;;  %s870_s18 = smov [#allocation5]   ;;  %s776_s22 = scalar_lea.hbm %s1016_s1, 6144 }
   0x3   :  { %s28_s19 = sshll.u32 %s870_s18, 4  ;;  %p777_p0 = scmp.ne.s32.totalorder %s1016_s1, %s776_s22  ;;  %s29_s19 = int_to_ptr.vmem [resolvable:$true] %s28_s19 }
   0x4   :  { %p780_p1 = scmp.lt.u32.totalorder %s776_s22, %s1016_s1 }
   0x6   :  { %p782_p2 = pnand %p780_p1, %p777_p0 }
   0x8   :  { %785 = shalt.err (!%p782_p2)
}
   0x9   :  { %s786_s27 = scalar_lea.vmem %s29_s19, 6144  ;;  %p791_p4 = scmp.lt.s32.totalorder %s29_s19, %s29_s19 }
   0xa   :  { %p787_p3 = scmp.ne.s32.totalorder %s29_s19, %s786_s27  ;;  %p792_p5 = scmp.lt.s32.totalorder %s786_s27, %s786_s27 }
   0xc   :  { %p793_p6 = por %p792_p5, %p791_p4 }
   0xe   :  { %p794_p7 = pnand %p793_p6, %p787_p3 }
  0x10   :  { %797 = shalt.err (!%p794_p7)
}
  0x11   :  { %s871_s28 = smov 128   ;;  %s872_s29 = smov 8  }
  0x12   :  { %34 = dma.hbm_to_vmem [thread:$0]  %s1016_s1, 6144, %s29_s19, [#allocation6], %s871_s28, %s871_s28, %s872_s29  }
  0x13   :  { %s873_s7 = smov [#allocation2]   ;;  %s874_s9 = smov [#allocation7]  }
  0x14   :  { %s19_s8 = sshll.u32 %s873_s7, 4  ;;  %s42_s10 = sshll.u32 %s874_s9, 4  ;;  %s20_s8 = int_to_ptr.vmem [resolvable:$true] %s19_s8  ;;  %s43_s10 = int_to_ptr.vmem [resolvable:$true] %s42_s10 }
  0x15   :  { %s798_s13 = scalar_lea.hbm %s1015_s0, 128 }
  0x16   :  { %p799_p8 = scmp.ne.s32.totalorder %s1015_s0, %s798_s13  ;;  %p802_p9 = scmp.lt.u32.totalorder %s798_s13, %s1015_s0 }
  0x18   :  { %p804_p10 = pnand %p802_p9, %p799_p8 }
  0x1a   :  { %807 = shalt.err (!%p804_p10)
}
  0x1b   :  { %s808_s1 = scalar_lea.vmem %s20_s8, 128  ;;  %p813_p12 = scmp.lt.s32.totalorder %s20_s8, %s20_s8 }
  0x1c   :  { %p809_p11 = scmp.ne.s32.totalorder %s20_s8, %s808_s1  ;;  %p814_p13 = scmp.lt.s32.totalorder %s808_s1, %s808_s1 }
  0x1e   :  { %p815_p0 = por %p814_p13, %p813_p12 }
  0x20   :  { %p816_p1 = pnand %p815_p0, %p809_p11 }
  0x22   :  { %819 = shalt.err (!%p816_p1)
}
  0x23   :  { %22 = dma.hbm_to_vmem [thread:$0]  %s1015_s0, 128, %s20_s8, [#allocation3]  }
  0x24   :  { %s820_s22 = scalar_lea.hbm %s1018_s3, 2048 }
  0x25   :  { %p821_p2 = scmp.ne.s32.totalorder %s1018_s3, %s820_s22  ;;  %p824_p3 = scmp.lt.u32.totalorder %s820_s22, %s1018_s3 }
  0x27   :  { %p826_p4 = pnand %p824_p3, %p821_p2 }
  0x29   :  { %829 = shalt.err (!%p826_p4)
}
  0x2a   :  { %s830_s27 = scalar_lea.vmem %s43_s10, 2048  ;;  %p835_p6 = scmp.lt.s32.totalorder %s43_s10, %s43_s10 }
  0x2b   :  { %p831_p5 = scmp.ne.s32.totalorder %s43_s10, %s830_s27  ;;  %p836_p7 = scmp.lt.s32.totalorder %s830_s27, %s830_s27 }
  0x2d   :  { %p837_p8 = por %p836_p7, %p835_p6 }
  0x2f   :  { %p838_p9 = pnand %p837_p8, %p831_p5 }
  0x31   :  { %841 = shalt.err (!%p838_p9)
}
  0x32   :  { %48 = dma.hbm_to_vmem [thread:$0]  %s1018_s3, 2048, %s43_s10, [#allocation6], %s871_s28, %s871_s28, %s872_s29  }
  0x33   :  { %864 = dma.done.wait [#allocation3], 128  }
  0x34   :  { %865 = vsyncadd [#allocation3], 4294967168 }
  0x35   :  { %866 = dma.done.wait [#allocation6], 8192  }
  0x36   :  { %867 = vsyncadd [#allocation6], 4294959104  ;;  %v875_v0 = vmov 0.0|0.0   ;;  %vm876_vm0 = vmmov 0   ;;  %v877_v1 = vmov 0.0   ;;  %v61_v2 = vld [vmem:[#allocation5] sm:$0xff] }
  0x37   :  { %671 = vmatprep.subr.bf16.mxu0 %v875_v0  ;;  %563 = vmatprep.mubr.msk.f32.mxu0 %vm876_vm0, %v877_v1  ;;  %v62_v3 = vld [vmem:[#allocation5 + $0x8] sm:$0xff]  ;;  %v63_v4 = vld [vmem:[#allocation5 + $0x10] sm:$0xff]  ;;  %v64_v6 = vld [vmem:[#allocation5 + $0x18] sm:$0xff]  ;;  %s878_s11 = smov [#allocation8]  }
  0x38   :  { %695 = vmatprep.subr.bf16.mxu1 %v875_v0  ;;  %598 = vmatprep.mubr.msk.f32.mxu1 %vm876_vm0, %v877_v1  ;;  %v672_v5 = vpack.c.bf16 %v62_v3, %v61_v2  ;;  %v675_v7 = vpack.c.bf16 %v64_v6, %v63_v4  ;;  %v65_v8 = vld [vmem:[#allocation5 + $0x20] sm:$0xff]  ;;  %v66_v9 = vld [vmem:[#allocation5 + $0x28] sm:$0xff]  ;;  %v158_v12 = vld [vmem:[#allocation5 + $0x90] sm:$0xff]  ;;  %s447_s12 = sshll.u32 %s878_s11, 4  ;;  %s448_s12 = int_to_ptr.vmem [resolvable:$true] %s447_s12 }
  0x39   :  { %v156_v10 = vld [vmem:[#allocation5 + $0x80] sm:$0xff]  ;;  %v157_v11 = vld [vmem:[#allocation5 + $0x88] sm:$0xff]  ;;  %v159_v13 = vld [vmem:[#allocation5 + $0x98] sm:$0xff]  ;;  %v678_v14 = vpack.c.bf16 %v66_v9, %v65_v8  ;;  %s842_s13 = scalar_lea.vmem %s448_s12, 128  ;;  %p847_p11 = scmp.lt.s32.totalorder %s448_s12, %s448_s12 }
  0x3a   :  { %673 = vmatpush3.bf16.msra.mxu0 %v672_v5  ;;  %v696_v15 = vpack.c.bf16 %v157_v11, %v156_v10  ;;  %v67_v16 = vld [vmem:[#allocation5 + $0x30] sm:$0xff]  ;;  %v68_v17 = vld [vmem:[#allocation5 + $0x38] sm:$0xff]  ;;  %v699_v18 = vpack.c.bf16 %v159_v13, %v158_v12  ;;  %v160_v19 = vld [vmem:[#allocation5 + $0xa0] sm:$0xff]  ;;  %p843_p10 = scmp.ne.s32.totalorder %s448_s12, %s842_s13  ;;  %p848_p12 = scmp.lt.s32.totalorder %s842_s13, %s842_s13 }
  0x3b   :  { %674 = vmatprep.subr.bf16.mxu0 %v875_v0  ;;  %v161_v20 = vld [vmem:[#allocation5 + $0xa8] sm:$0xff]  ;;  %v681_v21 = vpack.c.bf16 %v68_v17, %v67_v16  ;;  %v69_v22 = vld [vmem:[#allocation5 + $0x40] sm:$0xff]  ;;  %v162_v25 = vld [vmem:[#allocation5 + $0xb0] sm:$0xff] }
  0x3c   :  { %697 = vmatpush3.bf16.msra.mxu1 %v696_v15  ;;  %v70_v23 = vld [vmem:[#allocation5 + $0x48] sm:$0xff]  ;;  %v702_v24 = vpack.c.bf16 %v161_v20, %v160_v19  ;;  %v163_v26 = vld [vmem:[#allocation5 + $0xb8] sm:$0xff]  ;;  %v71_v28 = vld [vmem:[#allocation5 + $0x50] sm:$0xff]  ;;  %p849_p13 = por %p848_p12, %p847_p11 }
  0x3d   :  { %698 = vmatprep.subr.bf16.mxu1 %v875_v0  ;;  %v684_v27 = vpack.c.bf16 %v70_v23, %v69_v22  ;;  %v72_v29 = vld [vmem:[#allocation5 + $0x58] sm:$0xff]  ;;  %v705_v30 = vpack.c.bf16 %v163_v26, %v162_v25  ;;  %v164_v31 = vld [vmem:[#allocation5 + $0xc0] sm:$0xff]  ;;  %v165_v32 = vld [vmem:[#allocation5 + $0xc8] sm:$0xff] }
  0x3e   :  { %676 = vmatpush3.bf16.msra.mxu0 %v675_v7  ;;  %v687_v33 = vpack.c.bf16 %v72_v29, %v71_v28  ;;  %v73_v34 = vld [vmem:[#allocation5 + $0x60] sm:$0xff]  ;;  %v74_v35 = vld [vmem:[#allocation5 + $0x68] sm:$0xff]  ;;  %v708_v36 = vpack.c.bf16 %v165_v32, %v164_v31  ;;  %v166_v37 = vld [vmem:[#allocation5 + $0xd0] sm:$0xff]  ;;  %p850_p0 = pnand %p849_p13, %p843_p10 }
  0x3f   :  { %677 = vmatprep.subr.bf16.mxu0 %v875_v0  ;;  %v167_v38 = vld [vmem:[#allocation5 + $0xd8] sm:$0xff]  ;;  %v690_v39 = vpack.c.bf16 %v74_v35, %v73_v34  ;;  %v75_v40 = vld [vmem:[#allocation5 + $0x70] sm:$0xff]  ;;  %v168_v43 = vld [vmem:[#allocation5 + $0xe0] sm:$0xff] }
  0x40   :  { %700 = vmatpush3.bf16.msra.mxu1 %v699_v18  ;;  %v76_v41 = vld [vmem:[#allocation5 + $0x78] sm:$0xff]  ;;  %v711_v42 = vpack.c.bf16 %v167_v38, %v166_v37  ;;  %v169_v44 = vld [vmem:[#allocation5 + $0xe8] sm:$0xff]  ;;  %v170_v48 = vld [vmem:[#allocation5 + $0xf0] sm:$0xff] }
  0x41   :  { %701 = vmatprep.subr.bf16.mxu1 %v875_v0  ;;  %v693_v45 = vpack.c.bf16 %v76_v41, %v75_v40  ;;  %v714_v46 = vpack.c.bf16 %v169_v44, %v168_v43  ;;  %v60_v47 = vld [vmem:[#allocation2] sm:$0xff]  ;;  %v252_v51 = vld [vmem:[#allocation5 + $0x100] sm:$0xff]  ;;  %v253_v52 = vld [vmem:[#allocation5 + $0x108] sm:$0xff] }
  0x42   :  { %679 = vmatpush3.bf16.msra.mxu0 %v678_v14  ;;  %v171_v49 = vld [vmem:[#allocation5 + $0xf8] sm:$0xff]  ;;  %v254_v53 = vld [vmem:[#allocation5 + $0x110] sm:$0xff]  ;;  %v720_v54 = vpack.c.bf16 %v253_v52, %v252_v51  ;;  %v256_v57 = vld [vmem:[#allocation5 + $0x120] sm:$0xff] }
  0x43   :  { %680 = vmatprep.subr.bf16.mxu0 %v875_v0  ;;  %v717_v50 = vpack.c.bf16 %v171_v49, %v170_v48  ;;  %v255_v55 = vld [vmem:[#allocation5 + $0x118] sm:$0xff]  ;;  %v257_v58 = vld [vmem:[#allocation5 + $0x128] sm:$0xff]  ;;  %v258_v60 = vld [vmem:[#allocation5 + $0x130] sm:$0xff] }
  0x44   :  { %703 = vmatpush3.bf16.msra.mxu1 %v702_v24  ;;  %v723_v56 = vpack.c.bf16 %v255_v55, %v254_v53  ;;  %v726_v59 = vpack.c.bf16 %v257_v58, %v256_v57  ;;  %v259_v61 = vld [vmem:[#allocation5 + $0x138] sm:$0xff]  ;;  %v260_v63 = vld [vmem:[#allocation5 + $0x140] sm:$0xff]  ;;  %v261_v2 = vld [vmem:[#allocation5 + $0x148] sm:$0xff] }
  0x45   :  { %704 = vmatprep.subr.bf16.mxu1 %v875_v0  ;;  %v729_v62 = vpack.c.bf16 %v259_v61, %v258_v60  ;;  %v732_v3 = vpack.c.bf16 %v261_v2, %v260_v63  ;;  %v262_v4 = vld [vmem:[#allocation5 + $0x150] sm:$0xff]  ;;  %v263_v5 = vld [vmem:[#allocation5 + $0x158] sm:$0xff]  ;;  %v264_v7 = vld [vmem:[#allocation5 + $0x160] sm:$0xff] }
  0x46   :  { %682 = vmatpush3.bf16.msra.mxu0 %v681_v21  ;;  %v735_v6 = vpack.c.bf16 %v263_v5, %v262_v4  ;;  %v265_v8 = vld [vmem:[#allocation5 + $0x168] sm:$0xff]  ;;  %v457_v10 = vld [vmem:[%s1017_s2] ss:$0 sm:$0xff]  ;;  %v266_v15 = vld [vmem:[#allocation5 + $0x170] sm:$0xff] }
  0x47   :  { %683 = vmatprep.subr.bf16.mxu0 %v875_v0  ;;  %v738_v9 = vpack.c.bf16 %v265_v8, %v264_v7  ;;  %v267_v16 = vld [vmem:[#allocation5 + $0x178] sm:$0xff]  ;;  %v347_v18 = vld [vmem:[#allocation7] sm:$0xff]  ;;  %v348_v19 = vld [vmem:[#allocation7 + $0x8] sm:$0xff] }
  0x48   :  { %706 = vmatpush3.bf16.msra.mxu1 %v705_v30  ;;  %v741_v17 = vpack.c.bf16 %v267_v16, %v266_v15  ;;  %v349_v20 = vld [vmem:[#allocation7 + $0x10] sm:$0xff]  ;;  %v744_v21 = vpack.c.bf16 %v348_v19, %v347_v18  ;;  %v350_v22 = vld [vmem:[#allocation7 + $0x18] sm:$0xff]  ;;  %v351_v24 = vld [vmem:[#allocation7 + $0x20] sm:$0xff] }
  0x49   :  { %707 = vmatprep.subr.bf16.mxu1 %v875_v0  ;;  %v747_v23 = vpack.c.bf16 %v350_v22, %v349_v20  ;;  %v352_v25 = vld [vmem:[#allocation7 + $0x28] sm:$0xff]  ;;  %v355_v29 = vld [vmem:[#allocation7 + $0x40] sm:$0xff]  ;;  %v357_v32 = vld [vmem:[#allocation7 + $0x50] sm:$0xff] }
  0x4a   :  { %685 = vmatpush3.bf16.msra.mxu0 %v684_v27  ;;  %v750_v26 = vpack.c.bf16 %v352_v25, %v351_v24  ;;  %v354_v27 = vld [vmem:[#allocation7 + $0x38] sm:$0xff]  ;;  %v356_v30 = vld [vmem:[#allocation7 + $0x48] sm:$0xff]  ;;  %v359_v35 = vld [vmem:[#allocation7 + $0x60] sm:$0xff] }
  0x4b   :  { %686 = vmatprep.subr.bf16.mxu0 %v875_v0  ;;  %v756_v31 = vpack.c.bf16 %v356_v30, %v355_v29  ;;  %v459_v38 = vld [vmem:[%s1017_s2 + $0x1] ss:$0 sm:$0xff]  ;;  %v361_v43 = vld [vmem:[#allocation7 + $0x70] sm:$0xff] }
  0x4c   :  { %709 = vmatpush3.bf16.msra.mxu1 %v708_v36  ;;  %v360_v36 = vld [vmem:[#allocation7 + $0x68] sm:$0xff]  ;;  %v362_v44 = vld [vmem:[#allocation7 + $0x78] sm:$0xff] }
  0x4d   :  { %710 = vmatprep.subr.bf16.mxu1 %v875_v0  ;;  %v762_v37 = vpack.c.bf16 %v360_v36, %v359_v35 }
  0x4e   :  { %688 = vmatpush3.bf16.msra.mxu0 %v687_v33  ;;  %v358_v33 = vld [vmem:[#allocation7 + $0x58] sm:$0xff] }
  0x4f   :  { %689 = vmatprep.subr.bf16.mxu0 %v875_v0  ;;  %v759_v34 = vpack.c.bf16 %v358_v33, %v357_v32 }
  0x50   :  { %712 = vmatpush3.bf16.msra.mxu1 %v711_v42 }
  0x51   :  { %713 = vmatprep.subr.bf16.mxu1 %v875_v0 }
  0x52   :  { %691 = vmatpush3.bf16.msra.mxu0 %v690_v39 }
  0x53   :  { %692 = vmatprep.subr.bf16.mxu0 %v875_v0 }
  0x54   :  { %715 = vmatpush3.bf16.msra.mxu1 %v714_v46  ;;  %v461_v46 = vld [vmem:[%s1017_s2 + $0x2] ss:$0 sm:$0xff] }
  0x55   :  { %716 = vmatprep.subr.bf16.mxu1 %v875_v0 }
  0x56   :  { %694 = vmatpush3.bf16.msra.mxu0 %v693_v45  ;;  %v765_v45 = vpack.c.bf16 %v362_v44, %v361_v43 }
  0x57   :  { %719 = vmatprep.subr.bf16.mxu0 %v875_v0 }
  0x58   :  { %718 = vmatpush3.bf16.msra.mxu1 %v717_v50  ;;  %v462_v50 = vld [vmem:[%s1019_s4] ss:$0 sm:$0xff] }
  0x59   :  { %564 = vmatmul.mubr.f32.vlgmr.msra.gmra.mrb[0].mxu0 %v60_v47  ;;  %743 = vmatprep.subr.bf16.mxu1 %v875_v0 }
  0x5a   :  { %633 = vmatprep.mubr.msk.f32.mxu0 %vm876_vm0, %v877_v1  ;;  %721 = vmatpush3.bf16.msra.mxu0 %v720_v54 }
  0x5b   :  { %722 = vmatprep.subr.bf16.mxu0 %v875_v0 }
  0x5e   :  { %724 = vmatpush3.bf16.msra.mxu0 %v723_v56 }
  0x5f   :  { %725 = vmatprep.subr.bf16.mxu0 %v875_v0 }
  0x62   :  { %727 = vmatpush3.bf16.msra.mxu0 %v726_v59 }
  0x63   :  { %728 = vmatprep.subr.bf16.mxu0 %v875_v0 }
  0x66   :  { %730 = vmatpush3.bf16.msra.mxu0 %v729_v62 }
  0x67   :  { %731 = vmatprep.subr.bf16.mxu0 %v875_v0 }
  0x6a   :  { %733 = vmatpush3.bf16.msra.mxu0 %v732_v3 }
  0x6b   :  { %734 = vmatprep.subr.bf16.mxu0 %v875_v0 }
  0x6e   :  { %736 = vmatpush3.bf16.msra.mxu0 %v735_v6 }
  0x6f   :  { %737 = vmatprep.subr.bf16.mxu0 %v875_v0 }
  0x72   :  { %739 = vmatpush3.bf16.msra.mxu0 %v738_v9 }
  0x73   :  { %740 = vmatprep.subr.bf16.mxu0 %v875_v0 }
  0x76   :  { %742 = vmatpush3.bf16.msra.mxu0 %v741_v17 }
 0x12c   :  { %v150_v11 = vpop.f32.mrb[0].mxu0 }
 0x12d   :  { %v151_v12 = vadd.f32 %v457_v10, %v150_v11  ;;  %v565_v13 = vpop.f32.mrb[1].mxu0 }
 0x12f   :  { %v154_v14 = vmax.f32 %v151_v12, 0.0 }
 0x131   :  { %599 = vmatmul.mubr.f32.vlgmr.msra.gmra.mrb[0].mxu1 %v154_v14 }
 0x132   :  { %668 = vmatprep.mubr.msk.f32.mxu1 %vm876_vm0, %v877_v1  ;;  %745 = vmatpush3.bf16.msra.mxu1 %v744_v21  ;;  %v353_v1 = vld [vmem:[#allocation7 + $0x30] sm:$0xff] }
 0x133   :  { %746 = vmatprep.subr.bf16.mxu1 %v875_v0  ;;  %v753_v28 = vpack.c.bf16 %v354_v27, %v353_v1 }
 0x136   :  { %748 = vmatpush3.bf16.msra.mxu1 %v747_v23 }
 0x137   :  { %749 = vmatprep.subr.bf16.mxu1 %v875_v0 }
 0x13a   :  { %751 = vmatpush3.bf16.msra.mxu1 %v750_v26 }
 0x13b   :  { %752 = vmatprep.subr.bf16.mxu1 %v875_v0 }
 0x13e   :  { %754 = vmatpush3.bf16.msra.mxu1 %v753_v28 }
 0x13f   :  { %755 = vmatprep.subr.bf16.mxu1 %v875_v0 }
 0x142   :  { %757 = vmatpush3.bf16.msra.mxu1 %v756_v31 }
 0x143   :  { %758 = vmatprep.subr.bf16.mxu1 %v875_v0 }
 0x146   :  { %760 = vmatpush3.bf16.msra.mxu1 %v759_v34 }
 0x147   :  { %761 = vmatprep.subr.bf16.mxu1 %v875_v0 }
 0x14a   :  { %763 = vmatpush3.bf16.msra.mxu1 %v762_v37 }
 0x14b   :  { %764 = vmatprep.subr.bf16.mxu1 %v875_v0 }
 0x14e   :  { %766 = vmatpush3.bf16.msra.mxu1 %v765_v45 }
 0x204   :  { %v246_v39 = vpop.f32.mrb[0].mxu1 }
 0x205   :  { %v247_v40 = vadd.f32 %v459_v38, %v246_v39  ;;  %v600_v41 = vpop.f32.mrb[1].mxu1 }
 0x207   :  { %v250_v42 = vmax.f32 %v247_v40, 0.0 }
 0x209   :  { %634 = vmatmul.mubr.f32.vlgmr.msra.gmra.mrb[2].mxu0 %v250_v42 }
 0x2dc   :  { %v342_v47 = vpop.f32.mrb[2].mxu0 }
 0x2dd   :  { %v343_v48 = vadd.f32 %v461_v46, %v342_v47  ;;  %v635_v0 = vpop.f32.mrb[3].mxu0 }
 0x2df   :  { %v346_v49 = vmax.f32 %v343_v48, 0.0 }
 0x2e1   :  { %669 = vmatmul.mubr.f32.vlgmr.msra.gmra.mrb[2].mxu1 %v346_v49 }
 0x3b4   :  { %v436_v51 = vpop.f32.mrb[2].mxu1 }
 0x3b5   :  { %v437_v52 = vadd.f32 %v462_v50, %v436_v51  ;;  %v670_v53 = vpop.f32.mrb[3].mxu1 }
 0x3b7   :  { %440 = vst [vmem:[#allocation8] sm:$0xff] %v437_v52 }
 0x3b8   :  { %853 = shalt.err (!%p850_p0)
}
 0x3b9   :  { %s854_s15 = scalar_lea.hbm %s1020_s5, 128 }
 0x3ba   :  { %p855_p1 = scmp.ne.s32.totalorder %s1020_s5, %s854_s15  ;;  %p858_p2 = scmp.lt.u32.totalorder %s854_s15, %s1020_s5 }
 0x3bc   :  { %p860_p3 = pnand %p858_p2, %p855_p1 }
 0x3be   :  { %863 = shalt.err (!%p860_p3)
}
 0x3bf   :  { %450 = dma.vmem_to_hbm [thread:$0]  %s448_s12, 128, %s1020_s5, [#allocation4]  }
 0x3c0   :  { %868 = dma.done.wait [#allocation4], 128  }
 0x3c1   :  { %869 = vsyncadd [#allocation4], 4294967168 }
 0x3c2   :  { %454 = vsyncpa [#allocation3], 1 }
 0x3c3   :  { %455 = vsyncpa [#allocation6], 1 }
 0x3c4   :  { %456 = vsyncpa [#allocation4], 1 }

</bundles_post_ra>
